<compile_context>
chip_gen: v7x
topology: tpu7x:2x2x1
jax: 0.10.0
libtpu: 0.0.40
codegen_flags: <defaults>
</compile_context>

<pallas_src>
import functools

import jax
import jax.numpy as jnp
from jax.experimental import pallas as pl
from jax.experimental.pallas import tpu as pltpu

_LANE = 128
# bf16 adjacency bytes above which the whole-graph-resident fused kernel is
# abandoned for the streamed/tiled per-layer path.  24 MiB keeps the fused
# working set well inside v7x's 64 MiB VMEM (v5e/v6e have 128 MiB).
_FUSED_ADJ_BYTES_MAX = 24 * 1024 * 1024


def _round_up(x, m):
    return (x + m - 1) // m * m


# ---------------------------------------------------------------------------
# Kernel 1: whole GraphSAGE stack fused, graph resident in VMEM (small N).
# ---------------------------------------------------------------------------
def _fused_graphsage_kernel(adj_ref, deg_inv_ref, h0_ref, ws_ref, wn_ref,
                            b_ref, out_ref, *, n_layers_total):
    adj = adj_ref[...]            # (Np, Np) bf16 raw weighted adjacency
    deg_inv = deg_inv_ref[...]    # (Np, 1)  f32  1 / in-degree
    h = h0_ref[...]               # (Np, Dp) bf16 zero-padded features
    for l in range(n_layers_total):     # static unroll; L is tiny
        # mean aggregation: bf16 MXU matmul + one (nearly free) VPU row scale
        neigh = jnp.dot(adj, h, preferred_element_type=jnp.float32) * deg_inv
        # self + neighbour transform as two accumulating MXU passes
        # (no (Np, 2*Dp) concat copy)
        rst = (jnp.dot(h, ws_ref[l], preferred_element_type=jnp.float32)
               + jnp.dot(neigh.astype(jnp.bfloat16), wn_ref[l],
                         preferred_element_type=jnp.float32)
               + b_ref[l])
        if l < n_layers_total - 1:
            h = jnp.maximum(rst, 0.0).astype(jnp.bfloat16)  # ReLU; bf16 feed
        else:
            h = rst                                         # last layer: f32
    out_ref[...] = h.astype(out_ref.dtype)


# ---------------------------------------------------------------------------
# Kernel 2: one SAGEConv layer, adjacency streamed in (tm, tk) blocks.
#   grid = (rows, k); f32 accumulator scratch; pl.when init / finalize.
# ---------------------------------------------------------------------------
def _sage_layer_tiled_kernel(adj_ref, hk_ref, hself_ref, deg_inv_ref,
                             ws_ref, wn_ref, b_ref, out_ref, acc_ref, *,
                             apply_relu):
    k = pl.program_id(1)

    @pl.when(k == 0)
    def _():
        acc_ref[...] = jnp.zeros_like(acc_ref)

    acc_ref[...] += jnp.dot(adj_ref[...], hk_ref[...],
                            preferred_element_type=jnp.float32)

    @pl.when(k == pl.num_programs(1) - 1)
    def _():
        neigh = acc_ref[...] * deg_inv_ref[...]          # mean aggregation
        rst = (jnp.dot(hself_ref[...], ws_ref[...],
                       preferred_element_type=jnp.float32)
               + jnp.dot(neigh.astype(jnp.bfloat16), wn_ref[...],
                         preferred_element_type=jnp.float32)
               + b_ref[...])
        if apply_relu:
            rst = jnp.maximum(rst, 0.0)
        out_ref[...] = rst.astype(out_ref.dtype)


# ---------------------------------------------------------------------------
# Wrapper
# ---------------------------------------------------------------------------
def graphsage_forward(adj, deg, feats, params, *, force_tiled=False):
    """adj: (N,N) weighted adjacency (adj[v,u] = weight of edge u->v),
       deg: (N,1) in-degree counts (clamped >= 1), feats: (N,Din),
       params: list of (w_self, b_self, w_neigh, b_neigh) per SAGEConv layer."""
    n, in_feats = feats.shape
    out_dim = params[-1][0].shape[1]
    dims = [in_feats] + [p[0].shape[1] for p in params]
    d_pad = _round_up(max(dims), _LANE)      # lane-dense feature width
    n_layers_total = len(params)

    adj_bf16_bytes = _round_up(n, 16) ** 2 * 2
    use_fused = (not force_tiled) and adj_bf16_bytes <= _FUSED_ADJ_BYTES_MAX

    if use_fused:
        n_pad = _round_up(n, 16)             # bf16 sublane packing
        tm = tk = n_pad
    else:
        tm = min(512, _round_up(n, 16))      # row / k tile (multiple of 16)
        tk = tm
        n_pad = _round_up(n, tm)

    # --- padded device buffers (in production build these once at setup) ---
    adj_p = jnp.zeros((n_pad, n_pad), jnp.bfloat16).at[:n, :n].set(
        adj.astype(jnp.bfloat16))
    deg_inv = jnp.zeros((n_pad, 1), jnp.float32).at[:n, :].set(
        1.0 / deg.astype(jnp.float32))
    h0 = jnp.zeros((n_pad, d_pad), jnp.bfloat16).at[:n, :in_feats].set(
        feats.astype(jnp.bfloat16))
    ws_all = jnp.zeros((n_layers_total, d_pad, d_pad), jnp.bfloat16)
    wn_all = jnp.zeros((n_layers_total, d_pad, d_pad), jnp.bfloat16)
    b_all = jnp.zeros((n_layers_total, 1, d_pad), jnp.float32)
    for l, (ws, bs, wn, bn) in enumerate(params):
        din, dout = ws.shape
        ws_all = ws_all.at[l, :din, :dout].set(ws.astype(jnp.bfloat16))
        wn_all = wn_all.at[l, :din, :dout].set(wn.astype(jnp.bfloat16))
        b_all = b_all.at[l, 0, :dout].set((bs + bn).reshape(dout))

    flops_per_layer = 2 * n_pad * n_pad * d_pad + 4 * n_pad * d_pad * d_pad

    if use_fused:
        io_bytes = int(adj_p.size * 2 + deg_inv.size * 4 + h0.size * 2
                       + ws_all.size * 2 + wn_all.size * 2 + b_all.size * 4
                       + n_pad * d_pad * 4)
        vmem_limit = min(120 * 1024 * 1024,
                         max(2 * io_bytes + (16 << 20), 32 * 1024 * 1024))
        kern = functools.partial(_fused_graphsage_kernel,
                                 n_layers_total=n_layers_total)
        vmem_spec = pl.BlockSpec(memory_space=pltpu.MemorySpace.VMEM)
        out_p = pl.pallas_call(
            kern,
            out_shape=jax.ShapeDtypeStruct((n_pad, d_pad), jnp.float32),
            in_specs=[vmem_spec] * 6,
            out_specs=vmem_spec,
            compiler_params=pltpu.CompilerParams(vmem_limit_bytes=vmem_limit),
            cost_estimate=pl.CostEstimate(
                flops=n_layers_total * flops_per_layer,
                transcendentals=0, bytes_accessed=io_bytes),
        )(adj_p, deg_inv, h0, ws_all, wn_all, b_all)
        return out_p[:n, :out_dim]

    # --- streamed / tiled path: one pallas_call per layer --------------------
    grid = (n_pad // tm, n_pad // tk)
    tile_bytes = int(2 * tm * tk * 2 + 2 * tk * d_pad * 2 + 2 * tm * d_pad * 2
                     + 2 * tm * 4 + 2 * 2 * d_pad * d_pad * 2 + 2 * d_pad * 4
                     + 2 * tm * d_pad * 4 + tm * d_pad * 4)
    vmem_limit = min(120 * 1024 * 1024,
                     max(2 * tile_bytes + (16 << 20), 32 * 1024 * 1024))
    h = h0
    for l in range(n_layers_total):
        is_last = (l == n_layers_total - 1)
        out_dtype = jnp.float32 if is_last else jnp.bfloat16
        io_bytes = int(adj_p.size * 2 + 2 * h.size * h.dtype.itemsize
                       + deg_inv.size * 4 + 2 * d_pad * d_pad * 2 + d_pad * 4
                       + n_pad * d_pad * (4 if is_last else 2))
        kern = functools.partial(_sage_layer_tiled_kernel,
                                 apply_relu=not is_last)
        h = pl.pallas_call(
            kern,
            out_shape=jax.ShapeDtypeStruct((n_pad, d_pad), out_dtype),
            grid_spec=pltpu.PrefetchScalarGridSpec(
                num_scalar_prefetch=0,
                grid=grid,
                in_specs=[
                    pl.BlockSpec((tm, tk), lambda i, k: (i, k)),       # adj
                    pl.BlockSpec((tk, d_pad), lambda i, k: (k, 0)),    # h (k)
                    pl.BlockSpec((tm, d_pad), lambda i, k: (i, 0)),    # h self
                    pl.BlockSpec((tm, 1), lambda i, k: (i, 0)),        # 1/deg
                    pl.BlockSpec((d_pad, d_pad), lambda i, k: (0, 0)),  # W_self
                    pl.BlockSpec((d_pad, d_pad), lambda i, k: (0, 0)),  # W_neigh
                    pl.BlockSpec((1, d_pad), lambda i, k: (0, 0)),      # bias
                ],
                out_specs=pl.BlockSpec((tm, d_pad), lambda i, k: (i, 0)),
                scratch_shapes=[pltpu.VMEM((tm, d_pad), jnp.float32)],
            ),
            compiler_params=pltpu.CompilerParams(
                dimension_semantics=("parallel", "arbitrary"),
                vmem_limit_bytes=vmem_limit),
            cost_estimate=pl.CostEstimate(flops=flops_per_layer,
                                          transcendentals=0,
                                          bytes_accessed=io_bytes),
        )(adj_p, h, h, deg_inv, ws_all[l], wn_all[l], b_all[l])
    return h[:n, :out_dim].astype(jnp.float32)


# ---------------------------------------------------------------------------
# Parameter init (deterministic, mimics the PyTorch module's reset_parameters)
# ---------------------------------------------------------------------------
def _xavier_uniform(key, fan_in, fan_out, gain):
    bound = gain * (6.0 / (fan_in + fan_out)) ** 0.5
    # stored as (in, out) so forward is y = x @ W
    return jax.random.uniform(key, (fan_in, fan_out), jnp.float32, -bound, bound)


def init_graphsage_params(key, in_feats, n_hidden, out_dim, n_layers):
    """GraphSAGEModel: [in->hid (act)] + (n_layers-1) x [hid->hid (act)] + [hid->out]."""
    dims = ([(in_feats, n_hidden)]
            + [(n_hidden, n_hidden)] * (n_layers - 1)
            + [(n_hidden, out_dim)])
    gain = 2.0 ** 0.5  # calculate_gain('relu')
    params = []
    for din, dout in dims:
        key, k1, k2, k3, k4 = jax.random.split(key, 5)
        w_self = _xavier_uniform(k1, din, dout, gain)
        w_neigh = _xavier_uniform(k2, din, dout, gain)
        bb = 1.0 / (din ** 0.5)  # torch.nn.Linear default bias init range
        b_self = jax.random.uniform(k3, (1, dout), jnp.float32, -bb, bb)
        b_neigh = jax.random.uniform(k4, (1, dout), jnp.float32, -bb, bb)
        params.append((w_self, b_self, w_neigh, b_neigh))
    return params


# plain-JAX f32 reference (unfused, unpadded) for a sanity check
def graphsage_reference(adj, deg, feats, params):
    h = feats
    last = len(params) - 1
    for i, (ws, bs, wn, bn) in enumerate(params):
        h_neigh = (adj @ h) / deg
        rst = h @ ws + bs + h_neigh @ wn + bn
        if i < last:
            rst = jnp.maximum(rst, 0.0)
        h = rst
    return h


if __name__ == "__main__":
    N = 8           # number of nodes
    in_feats = 16
    n_hidden = 32
    out_dim = 8
    n_layers = 2    # -> 3 SAGEConv layers total

    key = jax.random.PRNGKey(0)
    key, k_mask, k_sim, k_feat, k_params = jax.random.split(key, 5)

    # small deterministic weighted graph (every node gets >= 1 in-edge;
    # deg stays clamped >= 1 so isolated nodes can never produce inf/NaN)
    rand_mask = jax.random.uniform(k_mask, (N, N)) > 0.5
    ring = jnp.roll(jnp.eye(N, dtype=jnp.float32), 1, axis=1) > 0   # edge (v+1)->v
    mask = jnp.logical_or(rand_mask, ring)
    similarity = jax.random.uniform(k_sim, (N, N), jnp.float32, 0.1, 1.0)
    adj = jnp.where(mask, similarity, 0.0)                           # (N, N)
    deg = jnp.maximum(jnp.sum(mask, axis=1, keepdims=True), 1).astype(jnp.float32)

    feats = jax.random.normal(k_feat, (N, in_feats), jnp.float32)    # (N, Din)
    params = init_graphsage_params(k_params, in_feats, n_hidden, out_dim, n_layers)

    ref = graphsage_reference(adj, deg, feats, params)

    out_fused = jax.block_until_ready(graphsage_forward(adj, deg, feats, params))
    out_tiled = jax.block_until_ready(
        graphsage_forward(adj, deg, feats, params, force_tiled=True))

    assert out_fused.shape == (N, out_dim) and out_tiled.shape == (N, out_dim)
    # bf16 MXU inputs with f32 accumulation -> expect ~1e-2-level relative
    # error vs the pure-f32 reference (per the review), so tolerances are loose.
    assert jnp.allclose(out_fused, ref, rtol=1e-1, atol=1e-1), (
        float(jnp.max(jnp.abs(out_fused - ref))))
    assert jnp.allclose(out_tiled, ref, rtol=1e-1, atol=1e-1), (
        float(jnp.max(jnp.abs(out_tiled - ref))))
    # both in-kernel paths compute the same bf16/f32 math
    assert jnp.allclose(out_fused, out_tiled, rtol=2e-2, atol=2e-2)

    print("KERNEL_OK")
</pallas_src>

<mosaic_0001>
module attributes {stable_mosaic.version = 11 : i64} {
  func.func @_fused_graphsage_kernel(%arg0: memref<16x16xbf16, #tpu.memory_space<vmem>>, %arg1: memref<16x1xf32, #tpu.memory_space<vmem>>, %arg2: memref<16x128xbf16, #tpu.memory_space<vmem>>, %arg3: memref<3x128x128xbf16, #tpu.memory_space<vmem>>, %arg4: memref<3x128x128xbf16, #tpu.memory_space<vmem>>, %arg5: memref<3x1x128xf32, #tpu.memory_space<vmem>>, %arg6: memref<16x128xf32, #tpu.memory_space<vmem>>) attributes {dimension_semantics = [], scalar_prefetch = 0 : i64, scratch_operands = 0 : i64, tpu.core_type = #tpu.core_type<tc>} {
    %c0 = arith.constant 0 : index
    %c0_0 = arith.constant 0 : index
    %0 = vector.load %arg0[%c0, %c0_0] : memref<16x16xbf16, #tpu.memory_space<vmem>>, vector<16x16xbf16>
    %c0_1 = arith.constant 0 : index
    %c0_2 = arith.constant 0 : index
    %1 = vector.load %arg1[%c0_1, %c0_2] : memref<16x1xf32, #tpu.memory_space<vmem>>, vector<16x1xf32>
    %c0_3 = arith.constant 0 : index
    %c0_4 = arith.constant 0 : index
    %2 = vector.load %arg2[%c0_3, %c0_4] : memref<16x128xbf16, #tpu.memory_space<vmem>>, vector<16x128xbf16>
    %cst = arith.constant dense<0.000000e+00> : vector<16x128xf32>
    %3 = tpu.matmul %0, %2, %cst {dimension_numbers = #tpu.dot_dimension_numbers<[1], [0], [0], [1], [0, 0, 1, 1], [], []>} : vector<16x16xbf16>, vector<16x128xbf16>, vector<16x128xf32> -> vector<16x128xf32>
    %4 = vector.broadcast %1 : vector<16x1xf32> to vector<16x128xf32>
    %5 = arith.mulf %3, %4 : vector<16x128xf32>
    %c0_5 = arith.constant 0 : index
    %c0_6 = arith.constant 0 : index
    %c0_7 = arith.constant 0 : index
    %6 = vector.load %arg3[%c0_5, %c0_6, %c0_7] : memref<3x128x128xbf16, #tpu.memory_space<vmem>>, vector<1x128x128xbf16>
    %7 = vector.shape_cast %6 : vector<1x128x128xbf16> to vector<128x128xbf16>
    %cst_8 = arith.constant dense<0.000000e+00> : vector<16x128xf32>
    %8 = tpu.matmul %2, %7, %cst_8 {dimension_numbers = #tpu.dot_dimension_numbers<[1], [0], [0], [1], [0, 0, 1, 1], [], []>} : vector<16x128xbf16>, vector<128x128xbf16>, vector<16x128xf32> -> vector<16x128xf32>
    %9 = arith.truncf %5 : vector<16x128xf32> to vector<16x128xbf16>
    %c0_9 = arith.constant 0 : index
    %c0_10 = arith.constant 0 : index
    %c0_11 = arith.constant 0 : index
    %10 = vector.load %arg4[%c0_9, %c0_10, %c0_11] : memref<3x128x128xbf16, #tpu.memory_space<vmem>>, vector<1x128x128xbf16>
    %11 = vector.shape_cast %10 : vector<1x128x128xbf16> to vector<128x128xbf16>
    %cst_12 = arith.constant dense<0.000000e+00> : vector<16x128xf32>
    %12 = tpu.matmul %9, %11, %cst_12 {dimension_numbers = #tpu.dot_dimension_numbers<[1], [0], [0], [1], [0, 0, 1, 1], [], []>} : vector<16x128xbf16>, vector<128x128xbf16>, vector<16x128xf32> -> vector<16x128xf32>
    %13 = arith.addf %8, %12 : vector<16x128xf32>
    %c0_13 = arith.constant 0 : index
    %c0_14 = arith.constant 0 : index
    %c0_15 = arith.constant 0 : index
    %14 = vector.load %arg5[%c0_13, %c0_14, %c0_15] : memref<3x1x128xf32, #tpu.memory_space<vmem>>, vector<1x1x128xf32>
    %15 = vector.shape_cast %14 : vector<1x1x128xf32> to vector<1x128xf32>
    %16 = vector.broadcast %15 : vector<1x128xf32> to vector<16x128xf32>
    %17 = arith.addf %13, %16 : vector<16x128xf32>
    %cst_16 = arith.constant 0.000000e+00 : f32
    %18 = vector.broadcast %cst_16 : f32 to vector<16x128xf32>
    %19 = arith.maximumf %17, %18 : vector<16x128xf32>
    %20 = arith.truncf %19 : vector<16x128xf32> to vector<16x128xbf16>
    %cst_17 = arith.constant dense<0.000000e+00> : vector<16x128xf32>
    %21 = tpu.matmul %0, %20, %cst_17 {dimension_numbers = #tpu.dot_dimension_numbers<[1], [0], [0], [1], [0, 0, 1, 1], [], []>} : vector<16x16xbf16>, vector<16x128xbf16>, vector<16x128xf32> -> vector<16x128xf32>
    %22 = vector.broadcast %1 : vector<16x1xf32> to vector<16x128xf32>
    %23 = arith.mulf %21, %22 : vector<16x128xf32>
    %c1 = arith.constant 1 : index
    %c0_18 = arith.constant 0 : index
    %c0_19 = arith.constant 0 : index
    %24 = vector.load %arg3[%c1, %c0_18, %c0_19] : memref<3x128x128xbf16, #tpu.memory_space<vmem>>, vector<1x128x128xbf16>
    %25 = vector.shape_cast %24 : vector<1x128x128xbf16> to vector<128x128xbf16>
    %cst_20 = arith.constant dense<0.000000e+00> : vector<16x128xf32>
    %26 = tpu.matmul %20, %25, %cst_20 {dimension_numbers = #tpu.dot_dimension_numbers<[1], [0], [0], [1], [0, 0, 1, 1], [], []>} : vector<16x128xbf16>, vector<128x128xbf16>, vector<16x128xf32> -> vector<16x128xf32>
    %27 = arith.truncf %23 : vector<16x128xf32> to vector<16x128xbf16>
    %c1_21 = arith.constant 1 : index
    %c0_22 = arith.constant 0 : index
    %c0_23 = arith.constant 0 : index
    %28 = vector.load %arg4[%c1_21, %c0_22, %c0_23] : memref<3x128x128xbf16, #tpu.memory_space<vmem>>, vector<1x128x128xbf16>
    %29 = vector.shape_cast %28 : vector<1x128x128xbf16> to vector<128x128xbf16>
    %cst_24 = arith.constant dense<0.000000e+00> : vector<16x128xf32>
    %30 = tpu.matmul %27, %29, %cst_24 {dimension_numbers = #tpu.dot_dimension_numbers<[1], [0], [0], [1], [0, 0, 1, 1], [], []>} : vector<16x128xbf16>, vector<128x128xbf16>, vector<16x128xf32> -> vector<16x128xf32>
    %31 = arith.addf %26, %30 : vector<16x128xf32>
    %c1_25 = arith.constant 1 : index
    %c0_26 = arith.constant 0 : index
    %c0_27 = arith.constant 0 : index
    %32 = vector.load %arg5[%c1_25, %c0_26, %c0_27] : memref<3x1x128xf32, #tpu.memory_space<vmem>>, vector<1x1x128xf32>
    %33 = vector.shape_cast %32 : vector<1x1x128xf32> to vector<1x128xf32>
    %34 = vector.broadcast %33 : vector<1x128xf32> to vector<16x128xf32>
    %35 = arith.addf %31, %34 : vector<16x128xf32>
    %cst_28 = arith.constant 0.000000e+00 : f32
    %36 = vector.broadcast %cst_28 : f32 to vector<16x128xf32>
    %37 = arith.maximumf %35, %36 : vector<16x128xf32>
    %38 = arith.truncf %37 : vector<16x128xf32> to vector<16x128xbf16>
    %cst_29 = arith.constant dense<0.000000e+00> : vector<16x128xf32>
    %39 = tpu.matmul %0, %38, %cst_29 {dimension_numbers = #tpu.dot_dimension_numbers<[1], [0], [0], [1], [0, 0, 1, 1], [], []>} : vector<16x16xbf16>, vector<16x128xbf16>, vector<16x128xf32> -> vector<16x128xf32>
    %40 = vector.broadcast %1 : vector<16x1xf32> to vector<16x128xf32>
    %41 = arith.mulf %39, %40 : vector<16x128xf32>
    %c2 = arith.constant 2 : index
    %c0_30 = arith.constant 0 : index
    %c0_31 = arith.constant 0 : index
    %42 = vector.load %arg3[%c2, %c0_30, %c0_31] : memref<3x128x128xbf16, #tpu.memory_space<vmem>>, vector<1x128x128xbf16>
    %43 = vector.shape_cast %42 : vector<1x128x128xbf16> to vector<128x128xbf16>
    %cst_32 = arith.constant dense<0.000000e+00> : vector<16x128xf32>
    %44 = tpu.matmul %38, %43, %cst_32 {dimension_numbers = #tpu.dot_dimension_numbers<[1], [0], [0], [1], [0, 0, 1, 1], [], []>} : vector<16x128xbf16>, vector<128x128xbf16>, vector<16x128xf32> -> vector<16x128xf32>
    %45 = arith.truncf %41 : vector<16x128xf32> to vector<16x128xbf16>
    %c2_33 = arith.constant 2 : index
    %c0_34 = arith.constant 0 : index
    %c0_35 = arith.constant 0 : index
    %46 = vector.load %arg4[%c2_33, %c0_34, %c0_35] : memref<3x128x128xbf16, #tpu.memory_space<vmem>>, vector<1x128x128xbf16>
    %47 = vector.shape_cast %46 : vector<1x128x128xbf16> to vector<128x128xbf16>
    %cst_36 = arith.constant dense<0.000000e+00> : vector<16x128xf32>
    %48 = tpu.matmul %45, %47, %cst_36 {dimension_numbers = #tpu.dot_dimension_numbers<[1], [0], [0], [1], [0, 0, 1, 1], [], []>} : vector<16x128xbf16>, vector<128x128xbf16>, vector<16x128xf32> -> vector<16x128xf32>
    %49 = arith.addf %44, %48 : vector<16x128xf32>
    %c2_37 = arith.constant 2 : index
    %c0_38 = arith.constant 0 : index
    %c0_39 = arith.constant 0 : index
    %50 = vector.load %arg5[%c2_37, %c0_38, %c0_39] : memref<3x1x128xf32, #tpu.memory_space<vmem>>, vector<1x1x128xf32>
    %51 = vector.shape_cast %50 : vector<1x1x128xf32> to vector<1x128xf32>
    %52 = vector.broadcast %51 : vector<1x128xf32> to vector<16x128xf32>
    %53 = arith.addf %49, %52 : vector<16x128xf32>
    %c0_40 = arith.constant 0 : index
    %c0_41 = arith.constant 0 : index
    %54 = vector.load %arg6[%c0_40, %c0_41] : memref<16x128xf32, #tpu.memory_space<vmem>>, vector<16x128xf32>
    tpu.vector_store %arg6[%c0_40, %c0_41], %53 {strides = array<i32>} : memref<16x128xf32, #tpu.memory_space<vmem>>, vector<16x128xf32>,
    return
  }
}

</mosaic_0001>

<bundles_post_ra>
// kernel: tpu_custom_call.1
= control target key start
LH: loop header
LB: loop body
LE: loop exit
PB: predicated region body
PF: predicated region fallthrough
CT: control target
= control target key end

     0   :  { %11 = vsyncpa [#allocation3], 0  ;;  %s1483_s0 = inlined_call_operand.vmem [shape: bf16[16,16], index: 0, kind: input, shape index: {}]   ;;  %s1484_s1 = inlined_call_operand.vmem [shape: f32[16,1], index: 1, kind: input, shape index: {}]   ;;  %s1485_s2 = inlined_call_operand.vmem [shape: bf16[16,128], index: 2, kind: input, shape index: {}]   ;;  %s1486_s3 = inlined_call_operand.hbm [shape: bf16[3,128,128], index: 3, kind: input, shape index: {}]   ;;  %s1487_s4 = inlined_call_operand.hbm [shape: bf16[3,128,128], index: 4, kind: input, shape index: {}]   ;;  %s1488_s5 = inlined_call_operand.vmem [shape: f32[3,1,128], index: 5, kind: input, shape index: {}]   ;;  %s1489_s6 = inlined_call_operand.hbm [shape: f32[16,128], index: 6, kind: output, shape index: {}]  }
   0x1   :  { %12 = vsyncpa [#allocation6], 0 }
   0x2   :  { %13 = vsyncpa [#allocation4], 0  ;;  %s1294_s21 = smov [#allocation2]   ;;  %s1222_s25 = scalar_lea.hbm %s1486_s3, 3072 }
   0x3   :  { %s25_s22 = sshll.u32 %s1294_s21, 4  ;;  %p1223_p0 = scmp.ne.s32.totalorder %s1486_s3, %s1222_s25  ;;  %s26_s22 = int_to_ptr.vmem [resolvable:$true] %s25_s22 }
   0x4   :  { %p1226_p1 = scmp.lt.u32.totalorder %s1222_s25, %s1486_s3 }
   0x6   :  { %p1228_p2 = pnand %p1226_p1, %p1223_p0 }
   0x8   :  { %1231 = shalt.err (!%p1228_p2)
}
   0x9   :  { %s1232_s30 = scalar_lea.vmem %s26_s22, 3072  ;;  %p1237_p4 = scmp.lt.s32.totalorder %s26_s22, %s26_s22 }
   0xa   :  { %p1233_p3 = scmp.ne.s32.totalorder %s26_s22, %s1232_s30  ;;  %p1238_p5 = scmp.lt.s32.totalorder %s1232_s30, %s1232_s30 }
   0xc   :  { %p1239_p6 = por %p1238_p5, %p1237_p4 }
   0xe   :  { %p1240_p7 = pnand %p1239_p6, %p1233_p3 }
  0x10   :  { %1243 = shalt.err (!%p1240_p7)
}
  0x11   :  { %s1295_s7 = smov 64   ;;  %s1296_s8 = smov 4  }
  0x12   :  { %31 = dma.hbm_to_vmem [thread:$0]  %s1486_s3, 3072, %s26_s22, [#allocation3], %s1295_s7, %s1295_s7, %s1296_s8  }
  0x13   :  { %s1297_s11 = smov [#allocation5]   ;;  %s1244_s15 = scalar_lea.hbm %s1487_s4, 3072 }
  0x14   :  { %s37_s12 = sshll.u32 %s1297_s11, 4  ;;  %p1245_p8 = scmp.ne.s32.totalorder %s1487_s4, %s1244_s15  ;;  %s38_s12 = int_to_ptr.vmem [resolvable:$true] %s37_s12 }
  0x15   :  { %p1248_p9 = scmp.lt.u32.totalorder %s1244_s15, %s1487_s4 }
  0x17   :  { %p1250_p10 = pnand %p1248_p9, %p1245_p8 }
  0x19   :  { %1253 = shalt.err (!%p1250_p10)
}
  0x1a   :  { %s1254_s20 = scalar_lea.vmem %s38_s12, 3072  ;;  %p1259_p12 = scmp.lt.s32.totalorder %s38_s12, %s38_s12 }
  0x1b   :  { %p1255_p11 = scmp.ne.s32.totalorder %s38_s12, %s1254_s20  ;;  %p1260_p13 = scmp.lt.s32.totalorder %s1254_s20, %s1254_s20 }
  0x1d   :  { %p1261_p0 = por %p1260_p13, %p1259_p12 }
  0x1f   :  { %p1262_p1 = pnand %p1261_p0, %p1255_p11 }
  0x21   :  { %1265 = shalt.err (!%p1262_p1)
}
  0x22   :  { %43 = dma.hbm_to_vmem [thread:$0]  %s1487_s4, 3072, %s38_s12, [#allocation6], %s1295_s7, %s1295_s7, %s1296_s8  }
  0x23   :  { %1288 = dma.done.wait [#allocation3], 3072  }
  0x24   :  { %1289 = vsyncadd [#allocation3], 4294964224 }
  0x25   :  { %1290 = dma.done.wait [#allocation6], 3072  }
  0x26   :  { %1291 = vsyncadd [#allocation6], 4294964224  ;;  %v1298_v0 = vmov 0.0   ;;  %vm1299_vm0 = vmmov 0   ;;  %v1300_v1 = vmov 0   ;;  %v1172_v2 = vld [vmem:[%s1485_s2] sm:$0xff]  }
  0x27   :  { %1023 = vmatprep.subr.bf16.mxu0 %v1298_v0  ;;  %1025 = vmatprep.mubr.msk.bf16.mxu0 %vm1299_vm0, %v1298_v0  ;;  %v1375_v3 = vld [vmem:[%s1483_s0] sm:$0xff]   ;;  %vm70_vm1 = vcmask 130048   ;;  %v56_v5 = vld [vmem:[%s1484_s1 + $0x8] sm:$0xff]  ;;  %v1178_v10 = vld [vmem:[#allocation2 + $0x10] sm:$0xff]   ;;  %s1301_s8 = smov [#allocation7]  }
  0x28   :  { %1171 = vset.pattern.permute.xlu0 %v1300_v1  ;;  %1029 = vmatprep.subr.bf16.mxu1 %v1298_v0  ;;  %v55_v4 = vld [vmem:[%s1484_s1] sm:$0xff]  ;;  %v1176_v8 = vld [vmem:[#allocation2 + $0x8] sm:$0xff]   ;;  %v1179_v11 = vld [vmem:[#allocation5 + $0x10] sm:$0xff]   ;;  %s892_s9 = sshll.u32 %s1301_s8, 4  ;;  %s893_s9 = int_to_ptr.vmem [resolvable:$true] %s892_s9 }
  0x29   :  { %1045 = vmatprep.mubr.msk.bf16.mxu1 %vm1299_vm0, %v1298_v0  ;;  %1024 = vmatpush3.bf16.msra.mxu0 %v1172_v2  ;;  %v1174_v6 = vld [vmem:[#allocation2] sm:$0xff]   ;;  %v1177_v9 = vld [vmem:[#allocation5 + $0x8] sm:$0xff]   ;;  %v1180_v12 = vld [vmem:[#allocation2 + $0x18] sm:$0xff]   ;;  %s1266_s10 = scalar_lea.vmem %s893_s9, 256  ;;  %p1271_p3 = scmp.lt.s32.totalorder %s893_s9, %s893_s9 }
  0x2a   :  { %117 = vperm.xlu0 %1171, %v55_v4   ;;  %1049 = vmatprep.subr.bf16.mxu0 %v1298_v0  ;;  %v1175_v7 = vld [vmem:[#allocation5] sm:$0xff]   ;;  %v1181_v13 = vld [vmem:[#allocation5 + $0x18] sm:$0xff]   ;;  %v1184_v16 = vld [vmem:[#allocation2 + $0x28] sm:$0xff]   ;;  %p1267_p2 = scmp.ne.s32.totalorder %s893_s9, %s1266_s10  ;;  %p1272_p4 = scmp.lt.s32.totalorder %s1266_s10, %s1266_s10 }
  0x2b   :  { %1030 = vmatpush3.bf16.msra.mxu1 %v1175_v7  ;;  %v1182_v14 = vld [vmem:[#allocation2 + $0x20] sm:$0xff]   ;;  %v1185_v17 = vld [vmem:[#allocation5 + $0x28] sm:$0xff]   ;;  %v1186_v18 = vld [vmem:[#allocation2 + $0x30] sm:$0xff]  }
  0x2c   :  { %1026 = vmatmul.mubr.msk.bf16.vlgmr.msra.gmra.mrb[0].mxu0 %vm70_vm1, %v1375_v3  ;;  %1031 = vmatprep.subr.bf16.mxu1 %v1298_v0  ;;  %v1183_v15 = vld [vmem:[#allocation5 + $0x20] sm:$0xff]   ;;  %v1187_v19 = vld [vmem:[#allocation5 + $0x30] sm:$0xff]   ;;  %v1188_v20 = vld [vmem:[#allocation2 + $0x38] sm:$0xff]   ;;  %p1273_p5 = por %p1272_p4, %p1271_p3 }
  0x2d   :  { %1050 = vmatpush3.bf16.msra.mxu0 %v1174_v6  ;;  %1065 = vmatprep.mubr.msk.bf16.mxu0 %vm1299_vm0, %v1298_v0  ;;  %v1189_v21 = vld [vmem:[#allocation5 + $0x38] sm:$0xff]   ;;  %v1198_v35 = vld [vmem:[#allocation5 + $0x40] sm:$0xff]   ;;  %v1199_v36 = vld [vmem:[#allocation5 + $0x48] sm:$0xff]  }
  0x2e   :  { %122 = vperm.xlu0 %1171, %v56_v5   ;;  %1051 = vmatprep.subr.bf16.mxu0 %v1298_v0  ;;  %v1200_v37 = vld [vmem:[#allocation5 + $0x50] sm:$0xff]   ;;  %v1201_v38 = vld [vmem:[#allocation5 + $0x58] sm:$0xff]   ;;  %v1202_v39 = vld [vmem:[#allocation5 + $0x60] sm:$0xff]   ;;  %p1274_p6 = pnand %p1273_p5, %p1267_p2 }
  0x2f   :  { %1032 = vmatpush3.bf16.msra.mxu1 %v1177_v9  ;;  %v1203_v40 = vld [vmem:[#allocation5 + $0x68] sm:$0xff]   ;;  %v924_v42 = vld [vmem:[%s1488_s5] ss:$0 sm:$0xff]  ;;  %v1192_v55 = vld [vmem:[#allocation2 + $0x50] sm:$0xff]  }
  0x30   :  { %1033 = vmatprep.subr.bf16.mxu1 %v1298_v0  ;;  %v1190_v53 = vld [vmem:[#allocation2 + $0x40] sm:$0xff]   ;;  %v1191_v54 = vld [vmem:[#allocation2 + $0x48] sm:$0xff]   ;;  %v1193_v56 = vld [vmem:[#allocation2 + $0x58] sm:$0xff]  }
  0x31   :  { %1052 = vmatpush3.bf16.msra.mxu0 %v1176_v8  ;;  %v1194_v57 = vld [vmem:[#allocation2 + $0x60] sm:$0xff]   ;;  %v1195_v58 = vld [vmem:[#allocation2 + $0x68] sm:$0xff]   ;;  %v1196_v59 = vld [vmem:[#allocation2 + $0x70] sm:$0xff]  }
  0x32   :  { %1053 = vmatprep.subr.bf16.mxu0 %v1298_v0  ;;  %v1197_v60 = vld [vmem:[#allocation2 + $0x78] sm:$0xff]   ;;  %v1204_v61 = vld [vmem:[#allocation5 + $0x70] sm:$0xff]  }
  0x33   :  { %1034 = vmatpush3.bf16.msra.mxu1 %v1179_v11  ;;  %v1205_v62 = vld [vmem:[#allocation5 + $0x78] sm:$0xff]  }
  0x34   :  { %1035 = vmatprep.subr.bf16.mxu1 %v1298_v0 }
  0x35   :  { %1054 = vmatpush3.bf16.msra.mxu0 %v1178_v10 }
  0x36   :  { %1055 = vmatprep.subr.bf16.mxu0 %v1298_v0 }
  0x37   :  { %1036 = vmatpush3.bf16.msra.mxu1 %v1181_v13  ;;  %v1215_v13 = vld [vmem:[#allocation5 + $0x88] sm:$0xff]  }
  0x38   :  { %1037 = vmatprep.subr.bf16.mxu1 %v1298_v0 }
  0x39   :  { %1056 = vmatpush3.bf16.msra.mxu0 %v1180_v12  ;;  %v1214_v12 = vld [vmem:[#allocation5 + $0x80] sm:$0xff]  }
  0x3a   :  { %1057 = vmatprep.subr.bf16.mxu0 %v1298_v0 }
  0x3b   :  { %1038 = vmatpush3.bf16.msra.mxu1 %v1183_v15  ;;  %v1217_v15 = vld [vmem:[#allocation5 + $0x98] sm:$0xff]  }
  0x3c   :  { %1039 = vmatprep.subr.bf16.mxu1 %v1298_v0 }
  0x3d   :  { %1058 = vmatpush3.bf16.msra.mxu0 %v1182_v14  ;;  %v1216_v14 = vld [vmem:[#allocation5 + $0x90] sm:$0xff]  }
  0x3e   :  { %1059 = vmatprep.subr.bf16.mxu0 %v1298_v0 }
  0x3f   :  { %1040 = vmatpush3.bf16.msra.mxu1 %v1185_v17  ;;  %v1219_v17 = vld [vmem:[#allocation5 + $0xa8] sm:$0xff]  }
  0x40   :  { %1041 = vmatprep.subr.bf16.mxu1 %v1298_v0 }
  0x41   :  { %1060 = vmatpush3.bf16.msra.mxu0 %v1184_v16  ;;  %v1218_v16 = vld [vmem:[#allocation5 + $0xa0] sm:$0xff]  }
  0x42   :  { %1061 = vmatprep.subr.bf16.mxu0 %v1298_v0 }
  0x43   :  { %1042 = vmatpush3.bf16.msra.mxu1 %v1187_v19  ;;  %v943_v19 = vld [vmem:[%s1488_s5 + $0x1] ss:$0 sm:$0xff] }
  0x44   :  { %1043 = vmatprep.subr.bf16.mxu1 %v1298_v0 }
  0x45   :  { %1062 = vmatpush3.bf16.msra.mxu0 %v1186_v18 }
  0x46   :  { %1063 = vmatprep.subr.bf16.mxu0 %v1298_v0 }
  0x47   :  { %1044 = vmatpush3.bf16.msra.mxu1 %v1189_v21 }
  0x48   :  { %1069 = vmatprep.subr.bf16.mxu1 %v1298_v0 }
  0x49   :  { %1064 = vmatpush3.bf16.msra.mxu0 %v1188_v20 }
  0x4a   :  { %1075 = vmatprep.subr.bf16.mxu0 %v1298_v0 }
  0x4c   :  { %1066 = vmatmul.mubr.bf16.vlgmr.msra.gmra.mrb[4].mxu0 %v1172_v2 }
  0x4d   :  { %1091 = vmatprep.mubr.msk.bf16.mxu0 %vm1299_vm0, %v1298_v0  ;;  %1076 = vmatpush3.bf16.msra.mxu0 %v1198_v35  ;;  %v1209_v35 = vld [vmem:[#allocation2 + $0x98] sm:$0xff]  }
  0x4e   :  { %1077 = vmatprep.subr.bf16.mxu0 %v1298_v0 }
  0x51   :  { %1078 = vmatpush3.bf16.msra.mxu0 %v1199_v36  ;;  %v1210_v36 = vld [vmem:[#allocation2 + $0xa0] sm:$0xff]  }
  0x52   :  { %1079 = vmatprep.subr.bf16.mxu0 %v1298_v0 }
  0x55   :  { %1080 = vmatpush3.bf16.msra.mxu0 %v1200_v37  ;;  %v1212_v37 = vld [vmem:[#allocation2 + $0xb0] sm:$0xff]  }
  0x56   :  { %1081 = vmatprep.subr.bf16.mxu0 %v1298_v0 }
  0x59   :  { %1082 = vmatpush3.bf16.msra.mxu0 %v1201_v38  ;;  %v1213_v38 = vld [vmem:[#allocation2 + $0xb8] sm:$0xff]  }
  0x5a   :  { %1083 = vmatprep.subr.bf16.mxu0 %v1298_v0 }
  0x5d   :  { %1084 = vmatpush3.bf16.msra.mxu0 %v1202_v39  ;;  %v1220_v39 = vld [vmem:[#allocation5 + $0xb0] sm:$0xff]  }
  0x5e   :  { %1085 = vmatprep.subr.bf16.mxu0 %v1298_v0 }
  0x61   :  { %1086 = vmatpush3.bf16.msra.mxu0 %v1203_v40  ;;  %v1221_v40 = vld [vmem:[#allocation5 + $0xb8] sm:$0xff]  }
  0x62   :  { %1087 = vmatprep.subr.bf16.mxu0 %v1298_v0 }
  0x65   :  { %1088 = vmatpush3.bf16.msra.mxu0 %v1204_v61 }
  0x66   :  { %1089 = vmatprep.subr.bf16.mxu0 %v1298_v0 }
  0x69   :  { %1090 = vmatpush3.bf16.msra.mxu0 %v1205_v62 }
  0x6a   :  { %1115 = vmatprep.subr.bf16.mxu0 %v1298_v0 }
  0xa9   :  { %v1406_v22 = vpop.permute.xlu0 %117 }
  0xad   :  { %v1408_v25 = vpop.permute.xlu0 %122 }
  0xff   :  { %v108_v23 = vpop.f32.mrb[0].mxu0 }
 0x100   :  { %v1027_v24 = vpop.f32.mrb[1].mxu0  ;;  %v125_v27 = vmul.f32 %v1406_v22, %v108_v23 }
 0x101   :  { %v111_v26 = vpop.f32.mrb[2].mxu0 }
 0x102   :  { %v126_v28 = vmul.f32 %v1408_v25, %v111_v26  ;;  %v1028_v29 = vpop.f32.mrb[3].mxu0 }
 0x104   :  { %v143_v30 = vpack.c.bf16 %v126_v28, %v125_v27 }
 0x106   :  { %1046 = vmatmul.mubr.bf16.vlgmr.msra.gmra.mrb[0].mxu1 %v143_v30 }
 0x107   :  { %1071 = vmatprep.mubr.msk.bf16.mxu1 %vm1299_vm0, %v1298_v0 }
 0x11f   :  { %v331_v31 = vpop.f32.mrb[4].mxu0 }
 0x120   :  { %v1067_v32 = vpop.f32.mrb[5].mxu0 }
 0x121   :  { %v334_v33 = vpop.f32.mrb[6].mxu0  ;;  %v1206_v32 = vld [vmem:[#allocation2 + $0x80] sm:$0xff]  }
 0x122   :  { %v1068_v34 = vpop.f32.mrb[7].mxu0 }
 0x123   :  { %v1208_v34 = vld [vmem:[#allocation2 + $0x90] sm:$0xff]  }
 0x1d9   :  { %v242_v41 = vpop.f32.mrb[0].mxu1 }
 0x1da   :  { %v332_v43 = vadd.f32 %v331_v31, %v242_v41  ;;  %v1047_v44 = vpop.f32.mrb[1].mxu1 }
 0x1db   :  { %v245_v45 = vpop.f32.mrb[2].mxu1 }
 0x1dc   :  { %v345_v46 = vadd.f32 %v924_v42, %v332_v43  ;;  %v335_v47 = vadd.f32 %v334_v33, %v245_v45  ;;  %v1048_v48 = vpop.f32.mrb[3].mxu1  ;;  %v1207_v33 = vld [vmem:[#allocation2 + $0x88] sm:$0xff]  }
 0x1de   :  { %v346_v49 = vadd.f32 %v924_v42, %v335_v47  ;;  %v347_v50 = vmax.f32 %v345_v46, 0.0 }
 0x1e0   :  { %v348_v51 = vmax.f32 %v346_v49, 0.0 }
 0x1e2   :  { %v349_v52 = vpack.c.bf16 %v348_v51, %v347_v50 }
 0x1e4   :  { %1070 = vmatpush3.bf16.msra.mxu1 %v349_v52 }
 0x1e5   :  { %1095 = vmatprep.subr.bf16.mxu1 %v1298_v0 }
 0x1e7   :  { %1072 = vmatmul.mubr.msk.bf16.vlgmr.msra.gmra.mrb[4].mxu1 %vm70_vm1, %v1375_v3 }
 0x1e8   :  { %1096 = vmatpush3.bf16.msra.mxu1 %v1190_v53  ;;  %1111 = vmatprep.mubr.msk.bf16.mxu1 %vm1299_vm0, %v1298_v0 }
 0x1e9   :  { %1097 = vmatprep.subr.bf16.mxu1 %v1298_v0 }
 0x1ec   :  { %1098 = vmatpush3.bf16.msra.mxu1 %v1191_v54 }
 0x1ed   :  { %1099 = vmatprep.subr.bf16.mxu1 %v1298_v0 }
 0x1f0   :  { %1100 = vmatpush3.bf16.msra.mxu1 %v1192_v55 }
 0x1f1   :  { %1101 = vmatprep.subr.bf16.mxu1 %v1298_v0 }
 0x1f4   :  { %1102 = vmatpush3.bf16.msra.mxu1 %v1193_v56 }
 0x1f5   :  { %1103 = vmatprep.subr.bf16.mxu1 %v1298_v0 }
 0x1f8   :  { %1104 = vmatpush3.bf16.msra.mxu1 %v1194_v57 }
 0x1f9   :  { %1105 = vmatprep.subr.bf16.mxu1 %v1298_v0 }
 0x1fc   :  { %1106 = vmatpush3.bf16.msra.mxu1 %v1195_v58 }
 0x1fd   :  { %1107 = vmatprep.subr.bf16.mxu1 %v1298_v0 }
 0x200   :  { %1108 = vmatpush3.bf16.msra.mxu1 %v1196_v59 }
 0x201   :  { %1109 = vmatprep.subr.bf16.mxu1 %v1298_v0 }
 0x204   :  { %1110 = vmatpush3.bf16.msra.mxu1 %v1197_v60 }
 0x205   :  { %1121 = vmatprep.subr.bf16.mxu1 %v1298_v0 }
 0x207   :  { %1112 = vmatmul.mubr.bf16.vlgmr.msra.gmra.mrb[8].mxu1 %v349_v52 }
 0x208   :  { %1137 = vmatprep.mubr.msk.bf16.mxu1 %vm1299_vm0, %v1298_v0  ;;  %1122 = vmatpush3.bf16.msra.mxu1 %v1214_v12 }
 0x209   :  { %1123 = vmatprep.subr.bf16.mxu1 %v1298_v0 }
 0x20c   :  { %1124 = vmatpush3.bf16.msra.mxu1 %v1215_v13 }
 0x20d   :  { %1125 = vmatprep.subr.bf16.mxu1 %v1298_v0 }
 0x210   :  { %1126 = vmatpush3.bf16.msra.mxu1 %v1216_v14 }
 0x211   :  { %1127 = vmatprep.subr.bf16.mxu1 %v1298_v0 }
 0x214   :  { %1128 = vmatpush3.bf16.msra.mxu1 %v1217_v15 }
 0x215   :  { %1129 = vmatprep.subr.bf16.mxu1 %v1298_v0 }
 0x218   :  { %1130 = vmatpush3.bf16.msra.mxu1 %v1218_v16 }
 0x219   :  { %1131 = vmatprep.subr.bf16.mxu1 %v1298_v0 }
 0x21c   :  { %1132 = vmatpush3.bf16.msra.mxu1 %v1219_v17 }
 0x21d   :  { %1133 = vmatprep.subr.bf16.mxu1 %v1298_v0 }
 0x220   :  { %1134 = vmatpush3.bf16.msra.mxu1 %v1220_v39 }
 0x221   :  { %1135 = vmatprep.subr.bf16.mxu1 %v1298_v0 }
 0x224   :  { %1136 = vmatpush3.bf16.msra.mxu1 %v1221_v40 }
 0x2ba   :  { %v384_v63 = vpop.f32.mrb[4].mxu1 }
 0x2bb   :  { %v1073_v1 = vpop.f32.mrb[5].mxu1  ;;  %v391_v4 = vmul.f32 %v384_v63, %v1406_v22 }
 0x2bc   :  { %v387_v2 = vpop.f32.mrb[6].mxu1 }
 0x2bd   :  { %v392_v5 = vmul.f32 %v387_v2, %v1408_v25  ;;  %v1074_v6 = vpop.f32.mrb[7].mxu1 }
 0x2bf   :  { %v410_v7 = vpack.c.bf16 %v392_v5, %v391_v4 }
 0x2c1   :  { %1092 = vmatmul.mubr.bf16.vlgmr.msra.gmra.mrb[8].mxu0 %v410_v7 }
 0x2c2   :  { %1117 = vmatprep.mubr.msk.bf16.mxu0 %vm1299_vm0, %v1298_v0 }
 0x2da   :  { %v599_v8 = vpop.f32.mrb[8].mxu1 }
 0x2db   :  { %v1113_v9 = vpop.f32.mrb[9].mxu1 }
 0x2dc   :  { %v602_v10 = vpop.f32.mrb[10].mxu1 }
 0x2dd   :  { %v1114_v11 = vpop.f32.mrb[11].mxu1 }
 0x394   :  { %v510_v18 = vpop.f32.mrb[8].mxu0 }
 0x395   :  { %v600_v20 = vadd.f32 %v599_v8, %v510_v18  ;;  %v1093_v21 = vpop.f32.mrb[9].mxu0 }
 0x396   :  { %v513_v23 = vpop.f32.mrb[10].mxu0 }
 0x397   :  { %v614_v24 = vadd.f32 %v943_v19, %v600_v20  ;;  %v603_v26 = vadd.f32 %v602_v10, %v513_v23  ;;  %v1094_v27 = vpop.f32.mrb[11].mxu0 }
 0x399   :  { %v615_v28 = vadd.f32 %v943_v19, %v603_v26  ;;  %v616_v29 = vmax.f32 %v614_v24, 0.0 }
 0x39b   :  { %v617_v30 = vmax.f32 %v615_v28, 0.0 }
 0x39d   :  { %v618_v31 = vpack.c.bf16 %v617_v30, %v616_v29 }
 0x39f   :  { %1116 = vmatpush3.bf16.msra.mxu0 %v618_v31 }
 0x3a0   :  { %1141 = vmatprep.subr.bf16.mxu0 %v1298_v0 }
 0x3a2   :  { %1118 = vmatmul.mubr.msk.bf16.vlgmr.msra.gmra.mrb[12].mxu0 %vm70_vm1, %v1375_v3  ;;  %v1211_v3 = vld [vmem:[#allocation2 + $0xa8] sm:$0xff]  }
 0x3a3   :  { %1142 = vmatpush3.bf16.msra.mxu0 %v1206_v32  ;;  %1157 = vmatprep.mubr.msk.bf16.mxu0 %vm1299_vm0, %v1298_v0 }
 0x3a4   :  { %1143 = vmatprep.subr.bf16.mxu0 %v1298_v0 }
 0x3a7   :  { %1144 = vmatpush3.bf16.msra.mxu0 %v1207_v33 }
 0x3a8   :  { %1145 = vmatprep.subr.bf16.mxu0 %v1298_v0 }
 0x3ab   :  { %1146 = vmatpush3.bf16.msra.mxu0 %v1208_v34 }
 0x3ac   :  { %1147 = vmatprep.subr.bf16.mxu0 %v1298_v0 }
 0x3af   :  { %1148 = vmatpush3.bf16.msra.mxu0 %v1209_v35 }
 0x3b0   :  { %1149 = vmatprep.subr.bf16.mxu0 %v1298_v0 }
 0x3b3   :  { %1150 = vmatpush3.bf16.msra.mxu0 %v1210_v36 }
 0x3b4   :  { %1151 = vmatprep.subr.bf16.mxu0 %v1298_v0 }
 0x3b7   :  { %1152 = vmatpush3.bf16.msra.mxu0 %v1211_v3 }
 0x3b8   :  { %1153 = vmatprep.subr.bf16.mxu0 %v1298_v0 }
 0x3bb   :  { %1154 = vmatpush3.bf16.msra.mxu0 %v1212_v37 }
 0x3bc   :  { %1155 = vmatprep.subr.bf16.mxu0 %v1298_v0  ;;  %v962_v0 = vld [vmem:[%s1488_s5 + $0x2] ss:$0 sm:$0xff] }
 0x3bf   :  { %1156 = vmatpush3.bf16.msra.mxu0 %v1213_v38 }
 0x3c2   :  { %1158 = vmatmul.mubr.bf16.vlgmr.msra.gmra.mrb[16].mxu0 %v618_v31 }
 0x475   :  { %v653_v41 = vpop.f32.mrb[12].mxu0 }
 0x476   :  { %v1119_v42 = vpop.f32.mrb[13].mxu0  ;;  %v660_v44 = vmul.f32 %v653_v41, %v1406_v22 }
 0x477   :  { %v656_v43 = vpop.f32.mrb[14].mxu0 }
 0x478   :  { %v661_v45 = vmul.f32 %v656_v43, %v1408_v25  ;;  %v1120_v46 = vpop.f32.mrb[15].mxu0 }
 0x47a   :  { %v679_v47 = vpack.c.bf16 %v661_v45, %v660_v44 }
 0x47c   :  { %1138 = vmatmul.mubr.bf16.vlgmr.msra.gmra.mrb[12].mxu1 %v679_v47 }
 0x495   :  { %v868_v48 = vpop.f32.mrb[16].mxu0 }
 0x496   :  { %v1159_v49 = vpop.f32.mrb[17].mxu0 }
 0x497   :  { %v871_v50 = vpop.f32.mrb[18].mxu0 }
 0x498   :  { %v1160_v51 = vpop.f32.mrb[19].mxu0 }
 0x54f   :  { %v779_v52 = vpop.f32.mrb[12].mxu1 }
 0x550   :  { %v869_v53 = vadd.f32 %v868_v48, %v779_v52  ;;  %v1139_v54 = vpop.f32.mrb[13].mxu1 }
 0x551   :  { %v782_v55 = vpop.f32.mrb[14].mxu1 }
 0x552   :  { %v883_v22 = vadd.f32 %v962_v0, %v869_v53  ;;  %v872_v56 = vadd.f32 %v871_v50, %v782_v55  ;;  %v1140_v25 = vpop.f32.mrb[15].mxu1 }
 0x554   :  { %885 = vst [vmem:[#allocation7] sm:$0xff] %v883_v22  ;;  %v884_v57 = vadd.f32 %v962_v0, %v872_v56 }
 0x556   :  { %886 = vst [vmem:[#allocation7 + $0x8] sm:$0xff] %v884_v57 }
 0x557   :  { %1277 = shalt.err (!%p1274_p6)
}
 0x558   :  { %s1278_s12 = scalar_lea.hbm %s1489_s6, 256 }
 0x559   :  { %p1279_p7 = scmp.ne.s32.totalorder %s1489_s6, %s1278_s12  ;;  %p1282_p8 = scmp.lt.u32.totalorder %s1278_s12, %s1489_s6 }
 0x55b   :  { %p1284_p9 = pnand %p1282_p8, %p1279_p7 }
 0x55d   :  { %1287 = shalt.err (!%p1284_p9)
}
 0x55e   :  { %s1302_s17 = smov 128   ;;  %s1303_s18 = smov 8  }
 0x55f   :  { %898 = dma.vmem_to_hbm [thread:$0]  %s893_s9, 256, %s1489_s6, [#allocation4], %s1302_s17, %s1302_s17, %s1303_s18  }
 0x560   :  { %1292 = dma.done.wait [#allocation4], 256  }
 0x561   :  { %1293 = vsyncadd [#allocation4], 4294967040 }
 0x562   :  { %902 = vsyncpa [#allocation3], 1 }
 0x563   :  { %903 = vsyncpa [#allocation6], 1 }
 0x564   :  { %904 = vsyncpa [#allocation4], 1 }

</bundles_post_ra>
